<compile_context>
chip_gen: v6e
topology: v6e:2x2x1
jax: 0.10.0
libtpu: 0.0.40
codegen_flags: <defaults>
</compile_context>

<pallas_src>
import jax
import jax.numpy as jnp
from jax.experimental import pallas as pl
from jax.experimental.pallas import tpu as pltpu


def _permute_kernel(x_ref, o_ref):
    # x_ref: (H, Sb, D)   o_ref: (Sb, H*D)
    H = x_ref.shape[0]
    # Interleave the heads along the lane axis -> lane-dense (Sb, H*D) value,
    # written with a single unmasked full-width store.
    o_ref[...] = jnp.concatenate([x_ref[h] for h in range(H)], axis=-1)


def permute_0213(x, *, s_block=None):
    """Pallas equivalent of x.permute(0, 2, 1, 3) for x of shape (B, H, S, D)."""
    B, H, S, D = x.shape

    if s_block is None:
        # Split S in two (use both TCs on v7x) when the halves stay (8,128)-
        # friendly; otherwise keep one big block (biggest-tile rule).
        if S % 2 == 0 and (S // 2) % 8 == 0:
            s_block = S // 2
        else:
            s_block = S
    assert S % s_block == 0, (S, s_block)

    grid = (B, S // s_block)

    out_flat = pl.pallas_call(
        _permute_kernel,
        out_shape=jax.ShapeDtypeStruct((B, S, H * D), x.dtype),
        grid=grid,
        in_specs=[
            pl.BlockSpec((None, H, s_block, D), lambda b, s: (b, 0, s, 0)),
        ],
        out_specs=pl.BlockSpec((None, s_block, H * D), lambda b, s: (b, s, 0)),
        compiler_params=pltpu.CompilerParams(
            dimension_semantics=("parallel", "parallel"),
        ),
    )(x)

    # Free metadata reshape back to the PyTorch output layout (B, S, H, D).
    return out_flat.reshape(B, S, H, D)


if __name__ == "__main__":
    key = jax.random.PRNGKey(0)
    # Same shape as the PyTorch module's input x139: [1, 4, 384, 64]
    x = jax.random.normal(key, (1, 4, 384, 64), dtype=jnp.float32)

    out = jax.block_until_ready(permute_0213(x))

    ref = jnp.transpose(x, (0, 2, 1, 3))
    assert out.shape == (1, 384, 4, 64), out.shape
    assert out.dtype == x.dtype
    assert bool(jnp.array_equal(out, ref))

    print("KERNEL_OK")
</pallas_src>

<mosaic_0001>
module attributes {stable_mosaic.version = 11 : i64} {
  func.func @_permute_kernel(%arg0: i32, %arg1: i32, %arg2: memref<1x4x192x64xf32, #tpu.memory_space<vmem>>, %arg3: memref<1x192x256xf32, #tpu.memory_space<vmem>>) attributes {dimension_semantics = [#tpu.dimension_semantics<parallel>, #tpu.dimension_semantics<parallel>], iteration_bounds = array<i64: 1, 2>, scalar_prefetch = 0 : i64, scratch_operands = 0 : i64, tpu.core_type = #tpu.core_type<tc>, window_params = [{transform_indices = @transform_0, window_bounds = array<i64: 1, 4, 192, 64>}, {transform_indices = @transform_1, window_bounds = array<i64: 1, 192, 256>}]} {
    %c0 = arith.constant 0 : index
    %c0_0 = arith.constant 0 : index
    %c0_1 = arith.constant 0 : index
    %c0_2 = arith.constant 0 : index
    %0 = vector.load %arg2[%c0, %c0_0, %c0_1, %c0_2] : memref<1x4x192x64xf32, #tpu.memory_space<vmem>>, vector<1x1x192x64xf32>
    %1 = vector.shape_cast %0 : vector<1x1x192x64xf32> to vector<192x64xf32>
    %c0_3 = arith.constant 0 : index
    %c1 = arith.constant 1 : index
    %c0_4 = arith.constant 0 : index
    %c0_5 = arith.constant 0 : index
    %2 = vector.load %arg2[%c0_3, %c1, %c0_4, %c0_5] : memref<1x4x192x64xf32, #tpu.memory_space<vmem>>, vector<1x1x192x64xf32>
    %3 = vector.shape_cast %2 : vector<1x1x192x64xf32> to vector<192x64xf32>
    %c0_6 = arith.constant 0 : index
    %c2 = arith.constant 2 : index
    %c0_7 = arith.constant 0 : index
    %c0_8 = arith.constant 0 : index
    %4 = vector.load %arg2[%c0_6, %c2, %c0_7, %c0_8] : memref<1x4x192x64xf32, #tpu.memory_space<vmem>>, vector<1x1x192x64xf32>
    %5 = vector.shape_cast %4 : vector<1x1x192x64xf32> to vector<192x64xf32>
    %c0_9 = arith.constant 0 : index
    %c3 = arith.constant 3 : index
    %c0_10 = arith.constant 0 : index
    %c0_11 = arith.constant 0 : index
    %6 = vector.load %arg2[%c0_9, %c3, %c0_10, %c0_11] : memref<1x4x192x64xf32, #tpu.memory_space<vmem>>, vector<1x1x192x64xf32>
    %7 = vector.shape_cast %6 : vector<1x1x192x64xf32> to vector<192x64xf32>
    %8 = tpu.concatenate %1, %3, %5, %7 in 1 : vector<192x64xf32>, vector<192x64xf32>, vector<192x64xf32>, vector<192x64xf32> -> vector<192x256xf32>
    %c0_12 = arith.constant 0 : index
    %c0_13 = arith.constant 0 : index
    %c0_14 = arith.constant 0 : index
    %9 = vector.load %arg3[%c0_12, %c0_13, %c0_14] : memref<1x192x256xf32, #tpu.memory_space<vmem>>, vector<1x192x256xf32>
    %10 = vector.shape_cast %9 : vector<1x192x256xf32> to vector<192x256xf32>
    %11 = vector.shape_cast %8 : vector<192x256xf32> to vector<1x192x256xf32>
    tpu.vector_store %arg3[%c0_12, %c0_13, %c0_14], %11 {strides = array<i32>} : memref<1x192x256xf32, #tpu.memory_space<vmem>>, vector<1x192x256xf32>,
    return
  }
  func.func @transform_0(%arg0: i32, %arg1: i32) -> (i32, i32, i32, i32) {
    %c0_i32 = arith.constant 0 : i32
    %c0_i32_0 = arith.constant 0 : i32
    %c0_i32_1 = arith.constant 0 : i32
    return %arg0, %c0_i32, %arg1, %c0_i32_0 : i32, i32, i32, i32
  }
  func.func @transform_1(%arg0: i32, %arg1: i32) -> (i32, i32, i32) {
    %c0_i32 = arith.constant 0 : i32
    %c0_i32_0 = arith.constant 0 : i32
    return %arg0, %arg1, %c0_i32 : i32, i32, i32
  }
}

</mosaic_0001>

<bundles_post_ra>
// kernel: tpu_custom_call.1
= control target key start
LH: loop header
LB: loop body
LE: loop exit
PB: predicated region body
PF: predicated region fallthrough
CT: control target
= control target key end

     0   :  { %6 = vsyncpa [#allocation4], 0  ;;  %s1841_s0 = inlined_call_operand.vmem [shape: f32[1,4,384,64], index: 0, kind: input, shape index: {}]   ;;  %s1842_s1 = inlined_call_operand.hbm [shape: f32[1,384,256], index: 1, kind: output, shape index: {}]  }
   0x1   :  { %8 = vsyncpa [#allocation4 + $0x1], 0  ;;  %s1277_s6 = smov 0   ;;  %s1279_s7 = smov 0  }
   0x2   :  { %s1281_s8 = smov 0   ;;  %s1283_s9 = smov 0  }
   0x3   :  { %s1285_s10 = smov 0   ;;  %s1287_s11 = smov 0  }
   0x4 LB: > { %s1038_s12 = sadd.s32 4294967295, %s1261_s11   ;;  %s1039_s13 = sadd.s32 4294967294, %s1261_s11   ;;  %s1261_s11 = sphi %s1287_s11, %s14_s11   ;;  %s1257_s10 = sphi %s1285_s10, %s1849_s10   ;;  %s1253_s9 = sphi %s1283_s9, %s1848_s9   ;;  %s1249_s8 = sphi %s1281_s8, %s1847_s8   ;;  %s1245_s7 = sphi %s1279_s7, %s1846_s7   ;;  %s1241_s6 = sphi %s1277_s6, %s1845_s6  }
   0x5   : > { %s23_s14 = sadd.s32 1, %s1257_s10  ;;  %s35_s15 = sadd.s32 1, %s1249_s8 }
   0x6   : > { %p24_p0 = scmp.ge.s32.totalorder %s23_s14, 2  ;;  %p42_p1 = scmp.ne.s32.totalorder %s1249_s8, %s1245_s7 }
   0x7   : > { %p43_p2 = scmp.eq.s32.totalorder %s1261_s11, 0  ;;  %p74_p3 = scmp.eq.s32.totalorder %s1038_s12, 1 }
   0x8   : > { %s1851_s14 = smov (%p24_p0, %s23_s14), 0  ;;  %p79_p6 = scmp.ne.s32.totalorder %s1245_s7, %s1241_s6 }
   0x9   : > { %p44_p4 = por %p43_p2, %p42_p1  ;;  %p1316_p5 = por %p74_p3, %p42_p1 }
   0xa   : > { %s31_s17 = ssub.s32 %s1257_s10, %s1851_s14  ;;  %p80_p8 = scmp.eq.s32.totalorder %s1039_s13, 1 }
   0xb   : > { %p33_p7 = scmp.eq.s32.totalorder %s31_s17, 0  ;;  %p1041_p10 = scmp.ge.s32.totalorder %s1261_s11, 2 }
   0xc   : > { %p1327_p9 = por %p80_p8, %p79_p6 }
   0xd   : > { %s1325_s18 = scalar_select %p33_p7, %s1249_s8, %s35_s15  }
   0xe   : > { %96 = sbr.rel (%p1041_p10) target bundleno = 72 (0x48), region = 16 }
  0x13   : > { %99 = sbr.rel (!%p44_p4) target bundleno = 72 (0x48), region = 20  ;;  %s101_s20 = sand.u32 (%p44_p4), 1, %s1249_s8  }
  0x14   : > { %s1120_s21 = smul.u32 (%p44_p4), 192, %s1257_s10 }
  0x15   : > { %s1124_s22 = smul.u32 (%p44_p4), 768, %s101_s20 }
  0x16   : > { %s1339_s25 = scalar_lea.vmem (%p44_p4), %s1841_s0, %s1120_s21 }
  0x17   : > { %v327_v0 = vld [vmem:[%s1339_s25] sm:$0xff] (%p44_p4)  ;;  %v329_v1 = vld [vmem:[%s1339_s25 + $0x8] sm:$0xff] (%p44_p4)  ;;  %v331_v2 = vld [vmem:[%s1339_s25 + $0x10] sm:$0xff] (%p44_p4)  ;;  %s1344_s26 = scalar_lea.vmem (%p44_p4), [#allocation2], %s1124_s22 }
  0x18   : > { %328 = vst [vmem:[%s1344_s26] sm:$0xff] %v327_v0  ;;  %330 = vst [vmem:[%s1344_s26 + $0x8] sm:$0xff] %v329_v1  ;;  %v333_v3 = vld [vmem:[%s1339_s25 + $0x18] sm:$0xff]  ;;  %v335_v4 = vld [vmem:[%s1339_s25 + $0x20] sm:$0xff] }
  0x19   : > { %332 = vst [vmem:[%s1344_s26 + $0x10] sm:$0xff] %v331_v2  ;;  %v337_v5 = vld [vmem:[%s1339_s25 + $0x28] sm:$0xff]  ;;  %334 = vst [vmem:[%s1344_s26 + $0x18] sm:$0xff] %v333_v3  ;;  %v339_v6 = vld [vmem:[%s1339_s25 + $0x30] sm:$0xff] }
  0x1a   : > { %336 = vst [vmem:[%s1344_s26 + $0x20] sm:$0xff] %v335_v4  ;;  %338 = vst [vmem:[%s1344_s26 + $0x28] sm:$0xff] %v337_v5  ;;  %v341_v7 = vld [vmem:[%s1339_s25 + $0x38] sm:$0xff]  ;;  %v343_v8 = vld [vmem:[%s1339_s25 + $0x40] sm:$0xff] }
  0x1b   : > { %340 = vst [vmem:[%s1344_s26 + $0x30] sm:$0xff] %v339_v6  ;;  %342 = vst [vmem:[%s1344_s26 + $0x38] sm:$0xff] %v341_v7  ;;  %v345_v9 = vld [vmem:[%s1339_s25 + $0x48] sm:$0xff]  ;;  %v347_v10 = vld [vmem:[%s1339_s25 + $0x50] sm:$0xff] }
  0x1c   : > { %344 = vst [vmem:[%s1344_s26 + $0x40] sm:$0xff] %v343_v8  ;;  %v349_v11 = vld [vmem:[%s1339_s25 + $0x58] sm:$0xff]  ;;  %346 = vst [vmem:[%s1344_s26 + $0x48] sm:$0xff] %v345_v9  ;;  %v351_v12 = vld [vmem:[%s1339_s25 + $0x60] sm:$0xff] }
  0x1d   : > { %348 = vst [vmem:[%s1344_s26 + $0x50] sm:$0xff] %v347_v10  ;;  %350 = vst [vmem:[%s1344_s26 + $0x58] sm:$0xff] %v349_v11  ;;  %v353_v13 = vld [vmem:[%s1339_s25 + $0x68] sm:$0xff]  ;;  %v355_v14 = vld [vmem:[%s1339_s25 + $0x70] sm:$0xff] }
  0x1e   : > { %352 = vst [vmem:[%s1344_s26 + $0x60] sm:$0xff] %v351_v12  ;;  %354 = vst [vmem:[%s1344_s26 + $0x68] sm:$0xff] %v353_v13  ;;  %v357_v15 = vld [vmem:[%s1339_s25 + $0x78] sm:$0xff]  ;;  %v359_v16 = vld [vmem:[%s1339_s25 + $0x80] sm:$0xff] }
  0x1f   : > { %356 = vst [vmem:[%s1344_s26 + $0x70] sm:$0xff] %v355_v14  ;;  %v361_v17 = vld [vmem:[%s1339_s25 + $0x88] sm:$0xff]  ;;  %358 = vst [vmem:[%s1344_s26 + $0x78] sm:$0xff] %v357_v15  ;;  %v363_v18 = vld [vmem:[%s1339_s25 + $0x90] sm:$0xff] }
  0x20   : > { %360 = vst [vmem:[%s1344_s26 + $0x80] sm:$0xff] %v359_v16  ;;  %362 = vst [vmem:[%s1344_s26 + $0x88] sm:$0xff] %v361_v17  ;;  %v365_v19 = vld [vmem:[%s1339_s25 + $0x98] sm:$0xff]  ;;  %v367_v20 = vld [vmem:[%s1339_s25 + $0xa0] sm:$0xff] }
  0x21   : > { %364 = vst [vmem:[%s1344_s26 + $0x90] sm:$0xff] %v363_v18  ;;  %366 = vst [vmem:[%s1344_s26 + $0x98] sm:$0xff] %v365_v19  ;;  %v369_v21 = vld [vmem:[%s1339_s25 + $0xa8] sm:$0xff]  ;;  %v371_v22 = vld [vmem:[%s1339_s25 + $0xb0] sm:$0xff] }
  0x22   : > { %368 = vst [vmem:[%s1344_s26 + $0xa0] sm:$0xff] %v367_v20  ;;  %v373_v23 = vld [vmem:[%s1339_s25 + $0xb8] sm:$0xff]  ;;  %370 = vst [vmem:[%s1344_s26 + $0xa8] sm:$0xff] %v369_v21  ;;  %v375_v24 = vld [vmem:[%s1339_s25 + $0x180] sm:$0xff] }
  0x23   : > { %372 = vst [vmem:[%s1344_s26 + $0xb0] sm:$0xff] %v371_v22  ;;  %374 = vst [vmem:[%s1344_s26 + $0xb8] sm:$0xff] %v373_v23  ;;  %v377_v25 = vld [vmem:[%s1339_s25 + $0x188] sm:$0xff]  ;;  %v379_v26 = vld [vmem:[%s1339_s25 + $0x190] sm:$0xff] }
  0x24   : > { %376 = vst [vmem:[%s1344_s26 + $0xc0] sm:$0xff] %v375_v24  ;;  %378 = vst [vmem:[%s1344_s26 + $0xc8] sm:$0xff] %v377_v25  ;;  %v381_v27 = vld [vmem:[%s1339_s25 + $0x198] sm:$0xff]  ;;  %v383_v28 = vld [vmem:[%s1339_s25 + $0x1a0] sm:$0xff] }
  0x25   : > { %380 = vst [vmem:[%s1344_s26 + $0xd0] sm:$0xff] %v379_v26  ;;  %v385_v29 = vld [vmem:[%s1339_s25 + $0x1a8] sm:$0xff]  ;;  %382 = vst [vmem:[%s1344_s26 + $0xd8] sm:$0xff] %v381_v27  ;;  %v387_v30 = vld [vmem:[%s1339_s25 + $0x1b0] sm:$0xff] }
  0x26   : > { %384 = vst [vmem:[%s1344_s26 + $0xe0] sm:$0xff] %v383_v28  ;;  %386 = vst [vmem:[%s1344_s26 + $0xe8] sm:$0xff] %v385_v29  ;;  %v389_v31 = vld [vmem:[%s1339_s25 + $0x1b8] sm:$0xff]  ;;  %v391_v32 = vld [vmem:[%s1339_s25 + $0x1c0] sm:$0xff] }
  0x27   : > { %388 = vst [vmem:[%s1344_s26 + $0xf0] sm:$0xff] %v387_v30  ;;  %390 = vst [vmem:[%s1344_s26 + $0xf8] sm:$0xff] %v389_v31  ;;  %v393_v33 = vld [vmem:[%s1339_s25 + $0x1c8] sm:$0xff]  ;;  %v395_v34 = vld [vmem:[%s1339_s25 + $0x1d0] sm:$0xff] }
  0x28   : > { %392 = vst [vmem:[%s1344_s26 + $0x100] sm:$0xff] %v391_v32  ;;  %v397_v35 = vld [vmem:[%s1339_s25 + $0x1d8] sm:$0xff]  ;;  %394 = vst [vmem:[%s1344_s26 + $0x108] sm:$0xff] %v393_v33  ;;  %v399_v36 = vld [vmem:[%s1339_s25 + $0x1e0] sm:$0xff] }
  0x29   : > { %396 = vst [vmem:[%s1344_s26 + $0x110] sm:$0xff] %v395_v34  ;;  %398 = vst [vmem:[%s1344_s26 + $0x118] sm:$0xff] %v397_v35  ;;  %v401_v37 = vld [vmem:[%s1339_s25 + $0x1e8] sm:$0xff]  ;;  %v403_v38 = vld [vmem:[%s1339_s25 + $0x1f0] sm:$0xff] }
  0x2a   : > { %400 = vst [vmem:[%s1344_s26 + $0x120] sm:$0xff] %v399_v36  ;;  %402 = vst [vmem:[%s1344_s26 + $0x128] sm:$0xff] %v401_v37  ;;  %v405_v39 = vld [vmem:[%s1339_s25 + $0x1f8] sm:$0xff]  ;;  %v407_v40 = vld [vmem:[%s1339_s25 + $0x200] sm:$0xff] }
  0x2b   : > { %404 = vst [vmem:[%s1344_s26 + $0x130] sm:$0xff] %v403_v38  ;;  %v409_v41 = vld [vmem:[%s1339_s25 + $0x208] sm:$0xff]  ;;  %406 = vst [vmem:[%s1344_s26 + $0x138] sm:$0xff] %v405_v39  ;;  %v411_v42 = vld [vmem:[%s1339_s25 + $0x210] sm:$0xff] }
  0x2c   : > { %408 = vst [vmem:[%s1344_s26 + $0x140] sm:$0xff] %v407_v40  ;;  %410 = vst [vmem:[%s1344_s26 + $0x148] sm:$0xff] %v409_v41  ;;  %v413_v43 = vld [vmem:[%s1339_s25 + $0x218] sm:$0xff]  ;;  %v415_v44 = vld [vmem:[%s1339_s25 + $0x220] sm:$0xff] }
  0x2d   : > { %412 = vst [vmem:[%s1344_s26 + $0x150] sm:$0xff] %v411_v42  ;;  %414 = vst [vmem:[%s1344_s26 + $0x158] sm:$0xff] %v413_v43  ;;  %v417_v45 = vld [vmem:[%s1339_s25 + $0x228] sm:$0xff]  ;;  %v419_v46 = vld [vmem:[%s1339_s25 + $0x230] sm:$0xff] }
  0x2e   : > { %416 = vst [vmem:[%s1344_s26 + $0x160] sm:$0xff] %v415_v44  ;;  %v421_v47 = vld [vmem:[%s1339_s25 + $0x238] sm:$0xff]  ;;  %418 = vst [vmem:[%s1344_s26 + $0x168] sm:$0xff] %v417_v45  ;;  %v423_v48 = vld [vmem:[%s1339_s25 + $0x300] sm:$0xff] }
  0x2f   : > { %420 = vst [vmem:[%s1344_s26 + $0x170] sm:$0xff] %v419_v46  ;;  %422 = vst [vmem:[%s1344_s26 + $0x178] sm:$0xff] %v421_v47  ;;  %v425_v49 = vld [vmem:[%s1339_s25 + $0x308] sm:$0xff]  ;;  %v427_v50 = vld [vmem:[%s1339_s25 + $0x310] sm:$0xff] }
  0x30   : > { %424 = vst [vmem:[%s1344_s26 + $0x180] sm:$0xff] %v423_v48  ;;  %426 = vst [vmem:[%s1344_s26 + $0x188] sm:$0xff] %v425_v49  ;;  %v429_v51 = vld [vmem:[%s1339_s25 + $0x318] sm:$0xff]  ;;  %v431_v52 = vld [vmem:[%s1339_s25 + $0x320] sm:$0xff] }
  0x31   : > { %428 = vst [vmem:[%s1344_s26 + $0x190] sm:$0xff] %v427_v50  ;;  %v433_v53 = vld [vmem:[%s1339_s25 + $0x328] sm:$0xff]  ;;  %430 = vst [vmem:[%s1344_s26 + $0x198] sm:$0xff] %v429_v51  ;;  %v435_v54 = vld [vmem:[%s1339_s25 + $0x330] sm:$0xff] }
  0x32   : > { %432 = vst [vmem:[%s1344_s26 + $0x1a0] sm:$0xff] %v431_v52  ;;  %434 = vst [vmem:[%s1344_s26 + $0x1a8] sm:$0xff] %v433_v53  ;;  %v437_v55 = vld [vmem:[%s1339_s25 + $0x338] sm:$0xff]  ;;  %v439_v56 = vld [vmem:[%s1339_s25 + $0x340] sm:$0xff] }
  0x33   : > { %436 = vst [vmem:[%s1344_s26 + $0x1b0] sm:$0xff] %v435_v54  ;;  %438 = vst [vmem:[%s1344_s26 + $0x1b8] sm:$0xff] %v437_v55  ;;  %v441_v57 = vld [vmem:[%s1339_s25 + $0x348] sm:$0xff]  ;;  %v443_v58 = vld [vmem:[%s1339_s25 + $0x350] sm:$0xff] }
  0x34   : > { %440 = vst [vmem:[%s1344_s26 + $0x1c0] sm:$0xff] %v439_v56  ;;  %v445_v59 = vld [vmem:[%s1339_s25 + $0x358] sm:$0xff]  ;;  %442 = vst [vmem:[%s1344_s26 + $0x1c8] sm:$0xff] %v441_v57  ;;  %v447_v60 = vld [vmem:[%s1339_s25 + $0x360] sm:$0xff] }
  0x35   : > { %444 = vst [vmem:[%s1344_s26 + $0x1d0] sm:$0xff] %v443_v58  ;;  %446 = vst [vmem:[%s1344_s26 + $0x1d8] sm:$0xff] %v445_v59  ;;  %v449_v61 = vld [vmem:[%s1339_s25 + $0x368] sm:$0xff]  ;;  %v451_v62 = vld [vmem:[%s1339_s25 + $0x370] sm:$0xff] }
  0x36   : > { %448 = vst [vmem:[%s1344_s26 + $0x1e0] sm:$0xff] %v447_v60  ;;  %450 = vst [vmem:[%s1344_s26 + $0x1e8] sm:$0xff] %v449_v61  ;;  %v453_v63 = vld [vmem:[%s1339_s25 + $0x378] sm:$0xff]  ;;  %v455_v0 = vld [vmem:[%s1339_s25 + $0x380] sm:$0xff] }
  0x37   : > { %452 = vst [vmem:[%s1344_s26 + $0x1f0] sm:$0xff] %v451_v62  ;;  %v457_v1 = vld [vmem:[%s1339_s25 + $0x388] sm:$0xff]  ;;  %454 = vst [vmem:[%s1344_s26 + $0x1f8] sm:$0xff] %v453_v63  ;;  %v459_v2 = vld [vmem:[%s1339_s25 + $0x390] sm:$0xff] }
  0x38   : > { %456 = vst [vmem:[%s1344_s26 + $0x200] sm:$0xff] %v455_v0  ;;  %458 = vst [vmem:[%s1344_s26 + $0x208] sm:$0xff] %v457_v1  ;;  %v461_v3 = vld [vmem:[%s1339_s25 + $0x398] sm:$0xff]  ;;  %v463_v4 = vld [vmem:[%s1339_s25 + $0x3a0] sm:$0xff] }
  0x39   : > { %460 = vst [vmem:[%s1344_s26 + $0x210] sm:$0xff] %v459_v2  ;;  %462 = vst [vmem:[%s1344_s26 + $0x218] sm:$0xff] %v461_v3  ;;  %v465_v5 = vld [vmem:[%s1339_s25 + $0x3a8] sm:$0xff]  ;;  %v467_v6 = vld [vmem:[%s1339_s25 + $0x3b0] sm:$0xff] }
  0x3a   : > { %464 = vst [vmem:[%s1344_s26 + $0x220] sm:$0xff] %v463_v4  ;;  %v469_v7 = vld [vmem:[%s1339_s25 + $0x3b8] sm:$0xff]  ;;  %466 = vst [vmem:[%s1344_s26 + $0x228] sm:$0xff] %v465_v5  ;;  %v471_v8 = vld [vmem:[%s1339_s25 + $0x480] sm:$0xff] }
  0x3b   : > { %468 = vst [vmem:[%s1344_s26 + $0x230] sm:$0xff] %v467_v6  ;;  %470 = vst [vmem:[%s1344_s26 + $0x238] sm:$0xff] %v469_v7  ;;  %v473_v9 = vld [vmem:[%s1339_s25 + $0x488] sm:$0xff]  ;;  %v475_v10 = vld [vmem:[%s1339_s25 + $0x490] sm:$0xff] }
  0x3c   : > { %472 = vst [vmem:[%s1344_s26 + $0x240] sm:$0xff] %v471_v8  ;;  %474 = vst [vmem:[%s1344_s26 + $0x248] sm:$0xff] %v473_v9  ;;  %v477_v11 = vld [vmem:[%s1339_s25 + $0x498] sm:$0xff]  ;;  %v479_v12 = vld [vmem:[%s1339_s25 + $0x4a0] sm:$0xff] }
  0x3d   : > { %476 = vst [vmem:[%s1344_s26 + $0x250] sm:$0xff] %v475_v10  ;;  %v481_v13 = vld [vmem:[%s1339_s25 + $0x4a8] sm:$0xff]  ;;  %478 = vst [vmem:[%s1344_s26 + $0x258] sm:$0xff] %v477_v11  ;;  %v483_v14 = vld [vmem:[%s1339_s25 + $0x4b0] sm:$0xff] }
  0x3e   : > { %480 = vst [vmem:[%s1344_s26 + $0x260] sm:$0xff] %v479_v12  ;;  %482 = vst [vmem:[%s1344_s26 + $0x268] sm:$0xff] %v481_v13  ;;  %v485_v15 = vld [vmem:[%s1339_s25 + $0x4b8] sm:$0xff]  ;;  %v487_v16 = vld [vmem:[%s1339_s25 + $0x4c0] sm:$0xff] }
  0x3f   : > { %484 = vst [vmem:[%s1344_s26 + $0x270] sm:$0xff] %v483_v14  ;;  %486 = vst [vmem:[%s1344_s26 + $0x278] sm:$0xff] %v485_v15  ;;  %v489_v17 = vld [vmem:[%s1339_s25 + $0x4c8] sm:$0xff]  ;;  %v491_v18 = vld [vmem:[%s1339_s25 + $0x4d0] sm:$0xff] }
  0x40   : > { %488 = vst [vmem:[%s1344_s26 + $0x280] sm:$0xff] %v487_v16  ;;  %v493_v19 = vld [vmem:[%s1339_s25 + $0x4d8] sm:$0xff]  ;;  %490 = vst [vmem:[%s1344_s26 + $0x288] sm:$0xff] %v489_v17  ;;  %v495_v20 = vld [vmem:[%s1339_s25 + $0x4e0] sm:$0xff] }
  0x41   : > { %492 = vst [vmem:[%s1344_s26 + $0x290] sm:$0xff] %v491_v18  ;;  %494 = vst [vmem:[%s1344_s26 + $0x298] sm:$0xff] %v493_v19  ;;  %v497_v21 = vld [vmem:[%s1339_s25 + $0x4e8] sm:$0xff]  ;;  %v499_v22 = vld [vmem:[%s1339_s25 + $0x4f0] sm:$0xff] }
  0x42   : > { %496 = vst [vmem:[%s1344_s26 + $0x2a0] sm:$0xff] %v495_v20  ;;  %498 = vst [vmem:[%s1344_s26 + $0x2a8] sm:$0xff] %v497_v21  ;;  %v501_v23 = vld [vmem:[%s1339_s25 + $0x4f8] sm:$0xff]  ;;  %v503_v24 = vld [vmem:[%s1339_s25 + $0x500] sm:$0xff] }
  0x43   : > { %500 = vst [vmem:[%s1344_s26 + $0x2b0] sm:$0xff] %v499_v22  ;;  %v505_v25 = vld [vmem:[%s1339_s25 + $0x508] sm:$0xff]  ;;  %502 = vst [vmem:[%s1344_s26 + $0x2b8] sm:$0xff] %v501_v23  ;;  %v507_v26 = vld [vmem:[%s1339_s25 + $0x510] sm:$0xff] }
  0x44   : > { %504 = vst [vmem:[%s1344_s26 + $0x2c0] sm:$0xff] %v503_v24  ;;  %506 = vst [vmem:[%s1344_s26 + $0x2c8] sm:$0xff] %v505_v25  ;;  %v509_v27 = vld [vmem:[%s1339_s25 + $0x518] sm:$0xff]  ;;  %v511_v28 = vld [vmem:[%s1339_s25 + $0x520] sm:$0xff] }
  0x45   : > { %508 = vst [vmem:[%s1344_s26 + $0x2d0] sm:$0xff] %v507_v26  ;;  %510 = vst [vmem:[%s1344_s26 + $0x2d8] sm:$0xff] %v509_v27  ;;  %v513_v29 = vld [vmem:[%s1339_s25 + $0x528] sm:$0xff]  ;;  %v515_v30 = vld [vmem:[%s1339_s25 + $0x530] sm:$0xff] }
  0x46   : > { %512 = vst [vmem:[%s1344_s26 + $0x2e0] sm:$0xff] %v511_v28  ;;  %v517_v31 = vld [vmem:[%s1339_s25 + $0x538] sm:$0xff]  ;;  %514 = vst [vmem:[%s1344_s26 + $0x2e8] sm:$0xff] %v513_v29 }
  0x47   : > { %516 = vst [vmem:[%s1344_s26 + $0x2f0] sm:$0xff] %v515_v30  ;;  %518 = vst [vmem:[%s1344_s26 + $0x2f8] sm:$0xff] %v517_v31 }
  0x48 PF: > { %p1043_p11 = scmp.ge.s32.totalorder %s1261_s11, 1  ;;  %p523_p12 = scmp.lt.s32.totalorder %s1261_s11, 3 }
  0x4a   : > { %p524_p13 = pnand %p1043_p11, %p523_p12 }
  0x4b   : > { %s1538_s27 = sand.u32 (!%p524_p13), 1, %s1245_s7   ;;  %s1263_s30 = smov (!%p524_p13), 64  }
  0x4c   : > { %527 = sbr.rel (%p524_p13) target bundleno = 304 (0x130), region = 58  ;;  %s1264_s20 = smov (!%p524_p13), [#allocation3]  }
  0x4d   : > { %s1125_s28 = smul.u32 (!%p524_p13), 768, %s1538_s27  ;;  %s1189_s21 = sshll.u32 (!%p524_p13), %s1264_s20, 4  ;;  %s1190_s21 = int_to_ptr.vmem [resolvable:$false] %s1189_s21 }
  0x4e   : > { %s1126_s2 = smul.u32 (!%p524_p13), 384, %s1538_s27  ;;  %s1191_s22 = scalar_lea.vmem (!%p524_p13), %s1190_s21, 12288 }
  0x4f   : > { %s1541_s29 = scalar_lea.vmem (!%p524_p13), [#allocation2], %s1125_s28  ;;  %s1123_s4 = smul.u32 (!%p524_p13), 6144, %s1253_s9 }
  0x50   : > { %s1644_s3 = scalar_lea.vmem (!%p524_p13), [#allocation3], %s1126_s2  ;;  %s940_s9 = scalar_lea.sflag (!%p524_p13), [#allocation4], %s1538_s27 }
  0x51   : > { %v1046_v32 = vld [vmem:[%s1541_s29 + $0xd0] sm:$0xff]  ;;  %v1044_v33 = vld [vmem:[%s1541_s29 + $0xc0] sm:$0xff]  ;;  %v1047_v34 = vld [vmem:[%s1541_s29 + $0xd8] sm:$0xff]  ;;  %vm842_vm0 = vcmask 523264   ;;  %s956_s5 = sshll.u32 %s1644_s3, 4  ;;  %s1787_s15 = scalar_lea.hbm %s1842_s1, %s1123_s4  ;;  %s1789_s5 = int_to_ptr.vmem [resolvable:$true] %s956_s5 }
  0x52   : > { %678 = vrot.lane.b32.xlu1 %v1046_v32, %s1263_s30  ;;  %674 = vrot.lane.b32.xlu0 %v1044_v33, %s1263_s30  ;;  %v1045_v35 = vld [vmem:[%s1541_s29 + $0xc8] sm:$0xff]  ;;  %v1048_v37 = vld [vmem:[%s1541_s29 + $0xe0] sm:$0xff]  ;;  %s1185_s17 = scalar_lea.vmem %s1789_s5, 6144  ;;  %p1192_p3 = scmp.lt.s32.totalorder %s1789_s5, %s1190_s21 }
  0x53   : > { %v1049_v36 = vld [vmem:[%s1541_s29 + $0xe8] sm:$0xff]  ;;  %v1051_v38 = vld [vmem:[%s1541_s29 + $0xf8] sm:$0xff]  ;;  %v1050_v39 = vld [vmem:[%s1541_s29 + $0xf0] sm:$0xff]  ;;  %p1186_p0 = scmp.ne.s32.totalorder %s1789_s5, %s1185_s17  ;;  %p1193_p4 = scmp.lt.s32.totalorder %s1191_s22, %s1185_s17 }
  0x54   : > { %v1053_v40 = vld [vmem:[%s1541_s29 + $0x108] sm:$0xff]  ;;  %v1052_v41 = vld [vmem:[%s1541_s29 + $0x100] sm:$0xff]  ;;  %v1055_v42 = vld [vmem:[%s1541_s29 + $0x118] sm:$0xff] }
  0x55   : > { %v1054_v43 = vld [vmem:[%s1541_s29 + $0x110] sm:$0xff]  ;;  %v1057_v44 = vld [vmem:[%s1541_s29 + $0x128] sm:$0xff]  ;;  %v1056_v45 = vld [vmem:[%s1541_s29 + $0x120] sm:$0xff]  ;;  %p1187_p1 = pnand %p1186_p0, %p1316_p5  ;;  %p1194_p6 = por %p1193_p4, %p1192_p3 }
  0x56   : > { %680 = vrot.lane.b32.xlu1 %v1047_v34, %s1263_s30  ;;  %676 = vrot.lane.b32.xlu0 %v1045_v35, %s1263_s30  ;;  %v1059_v46 = vld [vmem:[%s1541_s29 + $0x138] sm:$0xff]  ;;  %v1058_v47 = vld [vmem:[%s1541_s29 + $0x130] sm:$0xff] }
  0x57   : > { %v1061_v48 = vld [vmem:[%s1541_s29 + $0x148] sm:$0xff]  ;;  %v1060_v49 = vld [vmem:[%s1541_s29 + $0x140] sm:$0xff]  ;;  %v1063_v50 = vld [vmem:[%s1541_s29 + $0x158] sm:$0xff]  ;;  %p1188_p2 = pneg %p1187_p1 }
  0x58   : > { %v1062_v51 = vld [vmem:[%s1541_s29 + $0x150] sm:$0xff]  ;;  %v1065_v52 = vld [vmem:[%s1541_s29 + $0x168] sm:$0xff]  ;;  %v1064_v53 = vld [vmem:[%s1541_s29 + $0x160] sm:$0xff] }
  0x59   : > { %v1067_v54 = vld [vmem:[%s1541_s29 + $0x178] sm:$0xff]  ;;  %v1066_v55 = vld [vmem:[%s1541_s29 + $0x170] sm:$0xff]  ;;  %v1093_v56 = vld [vmem:[%s1541_s29 + $0x248] sm:$0xff]  ;;  %p1195_p7 = pnand %p1194_p6, %p1188_p2 }
  0x5a   : > { %684 = vrot.lane.b32.xlu1 %v1049_v36, %s1263_s30  ;;  %682 = vrot.lane.b32.xlu0 %v1048_v37, %s1263_s30  ;;  %v1092_v57 = vld [vmem:[%s1541_s29 + $0x240] sm:$0xff]  ;;  %v1095_v58 = vld [vmem:[%s1541_s29 + $0x258] sm:$0xff] }
  0x5b   : > { %v1094_v59 = vld [vmem:[%s1541_s29 + $0x250] sm:$0xff]  ;;  %v1097_v60 = vld [vmem:[%s1541_s29 + $0x268] sm:$0xff]  ;;  %v1096_v61 = vld [vmem:[%s1541_s29 + $0x260] sm:$0xff] }
  0x5c   : > { %v1099_v62 = vld [vmem:[%s1541_s29 + $0x278] sm:$0xff]  ;;  %v1098_v63 = vld [vmem:[%s1541_s29 + $0x270] sm:$0xff]  ;;  %v1101_v0 = vld [vmem:[%s1541_s29 + $0x288] sm:$0xff] }
  0x5d   : > { %v1100_v1 = vld [vmem:[%s1541_s29 + $0x280] sm:$0xff]  ;;  %v1103_v2 = vld [vmem:[%s1541_s29 + $0x298] sm:$0xff]  ;;  %v1102_v3 = vld [vmem:[%s1541_s29 + $0x290] sm:$0xff] }
  0x5e   : > { %688 = vrot.lane.b32.xlu1 %v1051_v38, %s1263_s30  ;;  %686 = vrot.lane.b32.xlu0 %v1050_v39, %s1263_s30  ;;  %v1105_v4 = vld [vmem:[%s1541_s29 + $0x2a8] sm:$0xff]  ;;  %v1104_v5 = vld [vmem:[%s1541_s29 + $0x2a0] sm:$0xff] }
  0x5f   : > { %v1107_v6 = vld [vmem:[%s1541_s29 + $0x2b8] sm:$0xff]  ;;  %v1106_v7 = vld [vmem:[%s1541_s29 + $0x2b0] sm:$0xff]  ;;  %v1109_v8 = vld [vmem:[%s1541_s29 + $0x2c8] sm:$0xff] }
  0x60   : > { %v1108_v9 = vld [vmem:[%s1541_s29 + $0x2c0] sm:$0xff]  ;;  %v1111_v10 = vld [vmem:[%s1541_s29 + $0x2d8] sm:$0xff]  ;;  %v1110_v11 = vld [vmem:[%s1541_s29 + $0x2d0] sm:$0xff] }
  0x61   : > { %v1113_v12 = vld [vmem:[%s1541_s29 + $0x2e8] sm:$0xff]  ;;  %v1112_v13 = vld [vmem:[%s1541_s29 + $0x2e0] sm:$0xff]  ;;  %v1115_v14 = vld [vmem:[%s1541_s29 + $0x2f8] sm:$0xff] }
  0x62   : > { %692 = vrot.lane.b32.xlu1 %v1053_v40, %s1263_s30  ;;  %690 = vrot.lane.b32.xlu0 %v1052_v41, %s1263_s30  ;;  %v1114_v15 = vld [vmem:[%s1541_s29 + $0x2f0] sm:$0xff]  ;;  %v551_v17 = vld [vmem:[%s1541_s29] sm:$0xff] }
  0x63   : > { %v553_v16 = vld [vmem:[%s1541_s29 + $0x10] sm:$0xff]  ;;  %v554_v22 = vld [vmem:[%s1541_s29 + $0x18] sm:$0xff]  ;;  %v552_v23 = vld [vmem:[%s1541_s29 + $0x8] sm:$0xff] }
  0x64   : > { %v556_v28 = vld [vmem:[%s1541_s29 + $0x28] sm:$0xff]  ;;  %v555_v29 = vld [vmem:[%s1541_s29 + $0x20] sm:$0xff]  ;;  %v558_v34 = vld [vmem:[%s1541_s29 + $0x38] sm:$0xff] }
  0x65   : > { %v557_v35 = vld [vmem:[%s1541_s29 + $0x30] sm:$0xff]  ;;  %v560_v40 = vld [vmem:[%s1541_s29 + $0x48] sm:$0xff]  ;;  %v559_v41 = vld [vmem:[%s1541_s29 + $0x40] sm:$0xff] }
  0x66   : > { %696 = vrot.lane.b32.xlu1 %v1055_v42, %s1263_s30  ;;  %694 = vrot.lane.b32.xlu0 %v1054_v43, %s1263_s30 }
  0x6a   : > { %700 = vrot.lane.b32.xlu1 %v1057_v44, %s1263_s30  ;;  %698 = vrot.lane.b32.xlu0 %v1056_v45, %s1263_s30 }
  0x6e   : > { %704 = vrot.lane.b32.xlu1 %v1059_v46, %s1263_s30  ;;  %702 = vrot.lane.b32.xlu0 %v1058_v47, %s1263_s30  ;;  %v562_v46 = vld [vmem:[%s1541_s29 + $0x58] sm:$0xff]  ;;  %v561_v47 = vld [vmem:[%s1541_s29 + $0x50] sm:$0xff] }
  0x72   : > { %708 = vrot.lane.b32.xlu1 %v1061_v48, %s1263_s30  ;;  %706 = vrot.lane.b32.xlu0 %v1060_v49, %s1263_s30 }
  0x76   : > { %712 = vrot.lane.b32.xlu1 %v1063_v50, %s1263_s30  ;;  %710 = vrot.lane.b32.xlu0 %v1062_v51, %s1263_s30 }
  0x7a   : > { %716 = vrot.lane.b32.xlu1 %v1065_v52, %s1263_s30  ;;  %714 = vrot.lane.b32.xlu0 %v1064_v53, %s1263_s30  ;;  %v564_v52 = vld [vmem:[%s1541_s29 + $0x68] sm:$0xff]  ;;  %v563_v53 = vld [vmem:[%s1541_s29 + $0x60] sm:$0xff] }
  0x7e   : > { %720 = vrot.lane.b32.xlu1 %v1067_v54, %s1263_s30  ;;  %718 = vrot.lane.b32.xlu0 %v1066_v55, %s1263_s30 }
  0x82   : > { %772 = vrot.lane.b32.xlu1 %v1093_v56, %s1263_s30  ;;  %770 = vrot.lane.b32.xlu0 %v1092_v57, %s1263_s30 }
  0x86   : > { %776 = vrot.lane.b32.xlu1 %v1095_v58, %s1263_s30  ;;  %774 = vrot.lane.b32.xlu0 %v1094_v59, %s1263_s30  ;;  %v566_v58 = vld [vmem:[%s1541_s29 + $0x78] sm:$0xff]  ;;  %v565_v59 = vld [vmem:[%s1541_s29 + $0x70] sm:$0xff] }
  0x8a   : > { %780 = vrot.lane.b32.xlu1 %v1097_v60, %s1263_s30  ;;  %778 = vrot.lane.b32.xlu0 %v1096_v61, %s1263_s30 }
  0x8e   : > { %784 = vrot.lane.b32.xlu1 %v1099_v62, %s1263_s30  ;;  %782 = vrot.lane.b32.xlu0 %v1098_v63, %s1263_s30 }
  0x92   : > { %788 = vrot.lane.b32.xlu1 %v1101_v0, %s1263_s30  ;;  %786 = vrot.lane.b32.xlu0 %v1100_v1, %s1263_s30  ;;  %v568_v0 = vld [vmem:[%s1541_s29 + $0x88] sm:$0xff]  ;;  %v567_v1 = vld [vmem:[%s1541_s29 + $0x80] sm:$0xff] }
  0x96   : > { %792 = vrot.lane.b32.xlu1 %v1103_v2, %s1263_s30  ;;  %790 = vrot.lane.b32.xlu0 %v1102_v3, %s1263_s30 }
  0x9a   : > { %796 = vrot.lane.b32.xlu1 %v1105_v4, %s1263_s30  ;;  %794 = vrot.lane.b32.xlu0 %v1104_v5, %s1263_s30 }
  0x9e   : > { %800 = vrot.lane.b32.xlu1 %v1107_v6, %s1263_s30  ;;  %798 = vrot.lane.b32.xlu0 %v1106_v7, %s1263_s30  ;;  %v570_v6 = vld [vmem:[%s1541_s29 + $0x98] sm:$0xff]  ;;  %v569_v7 = vld [vmem:[%s1541_s29 + $0x90] sm:$0xff] }
  0xa2   : > { %804 = vrot.lane.b32.xlu1 %v1109_v8, %s1263_s30  ;;  %802 = vrot.lane.b32.xlu0 %v1108_v9, %s1263_s30 }
  0xa6   : > { %808 = vrot.lane.b32.xlu1 %v1111_v10, %s1263_s30  ;;  %806 = vrot.lane.b32.xlu0 %v1110_v11, %s1263_s30 }
  0xaa   : > { %812 = vrot.lane.b32.xlu1 %v1113_v12, %s1263_s30  ;;  %810 = vrot.lane.b32.xlu0 %v1112_v13, %s1263_s30  ;;  %v572_v12 = vld [vmem:[%s1541_s29 + $0xa8] sm:$0xff]  ;;  %v571_v13 = vld [vmem:[%s1541_s29 + $0xa0] sm:$0xff] }
  0xae   : > { %816 = vrot.lane.b32.xlu1 %v1115_v14, %s1263_s30  ;;  %814 = vrot.lane.b32.xlu0 %v1114_v15, %s1263_s30 }
  0xc4   : > { %v679_v18 = vpop.permute.xlu1 %678  ;;  %v675_v19 = vpop.permute.xlu0 %674 }
  0xc5   : > { %v845_v20 = vsel %vm842_vm0, %v553_v16, %v679_v18  ;;  %v843_v21 = vsel %vm842_vm0, %v551_v17, %v675_v19  ;;  %v574_v18 = vld [vmem:[%s1541_s29 + $0xb8] sm:$0xff]  ;;  %v573_v19 = vld [vmem:[%s1541_s29 + $0xb0] sm:$0xff] }
  0xc6   : > { %895 = vst [vmem:[%s1644_s3 + $0x20] sm:$0xff] %v845_v20  ;;  %891 = vst [vmem:[%s1644_s3] sm:$0xff] %v843_v21 }
  0xc8   : > { %v681_v24 = vpop.permute.xlu1 %680  ;;  %v677_v25 = vpop.permute.xlu0 %676 }
  0xc9   : > { %v846_v26 = vsel %vm842_vm0, %v554_v22, %v681_v24  ;;  %v844_v27 = vsel %vm842_vm0, %v552_v23, %v677_v25  ;;  %v1069_v24 = vld [vmem:[%s1541_s29 + $0x188] sm:$0xff]  ;;  %v1068_v25 = vld [vmem:[%s1541_s29 + $0x180] sm:$0xff] }
  0xca   : > { %897 = vst [vmem:[%s1644_s3 + $0x30] sm:$0xff] %v846_v26  ;;  %893 = vst [vmem:[%s1644_s3 + $0x10] sm:$0xff] %v844_v27 }
  0xcc   : > { %v685_v30 = vpop.permute.xlu1 %684  ;;  %v683_v31 = vpop.permute.xlu0 %682 }
  0xcd   : > { %v848_v32 = vsel %vm842_vm0, %v556_v28, %v685_v30  ;;  %v847_v33 = vsel %vm842_vm0, %v555_v29, %v683_v31  ;;  %v1071_v30 = vld [vmem:[%s1541_s29 + $0x198] sm:$0xff]  ;;  %v1070_v31 = vld [vmem:[%s1541_s29 + $0x190] sm:$0xff] }
  0xce   : > { %901 = vst [vmem:[%s1644_s3 + $0x50] sm:$0xff] %v848_v32  ;;  %899 = vst [vmem:[%s1644_s3 + $0x40] sm:$0xff] %v847_v33 }
  0xd0   : > { %v689_v36 = vpop.permute.xlu1 %688  ;;  %v687_v37 = vpop.permute.xlu0 %686 }
  0xd1   : > { %v850_v38 = vsel %vm842_vm0, %v558_v34, %v689_v36  ;;  %v849_v39 = vsel %vm842_vm0, %v557_v35, %v687_v37  ;;  %v1073_v36 = vld [vmem:[%s1541_s29 + $0x1a8] sm:$0xff]  ;;  %v1072_v37 = vld [vmem:[%s1541_s29 + $0x1a0] sm:$0xff] }
  0xd2   : > { %905 = vst [vmem:[%s1644_s3 + $0x70] sm:$0xff] %v850_v38  ;;  %903 = vst [vmem:[%s1644_s3 + $0x60] sm:$0xff] %v849_v39 }
  0xd4   : > { %v693_v42 = vpop.permute.xlu1 %692  ;;  %v691_v43 = vpop.permute.xlu0 %690 }
  0xd5   : > { %v852_v44 = vsel %vm842_vm0, %v560_v40, %v693_v42  ;;  %v851_v45 = vsel %vm842_vm0, %v559_v41, %v691_v43  ;;  %v1075_v42 = vld [vmem:[%s1541_s29 + $0x1b8] sm:$0xff]  ;;  %v1074_v43 = vld [vmem:[%s1541_s29 + $0x1b0] sm:$0xff] }
  0xd6   : > { %909 = vst [vmem:[%s1644_s3 + $0x90] sm:$0xff] %v852_v44  ;;  %907 = vst [vmem:[%s1644_s3 + $0x80] sm:$0xff] %v851_v45 }
  0xd8   : > { %v697_v48 = vpop.permute.xlu1 %696  ;;  %v695_v49 = vpop.permute.xlu0 %694 }
  0xd9   : > { %v854_v50 = vsel %vm842_vm0, %v562_v46, %v697_v48  ;;  %v853_v51 = vsel %vm842_vm0, %v561_v47, %v695_v49  ;;  %v1077_v48 = vld [vmem:[%s1541_s29 + $0x1c8] sm:$0xff]  ;;  %v1076_v49 = vld [vmem:[%s1541_s29 + $0x1c0] sm:$0xff] }
  0xda   : > { %913 = vst [vmem:[%s1644_s3 + $0xb0] sm:$0xff] %v854_v50  ;;  %911 = vst [vmem:[%s1644_s3 + $0xa0] sm:$0xff] %v853_v51 }
  0xdc   : > { %v701_v54 = vpop.permute.xlu1 %700  ;;  %v699_v55 = vpop.permute.xlu0 %698 }
  0xdd   : > { %v856_v56 = vsel %vm842_vm0, %v564_v52, %v701_v54  ;;  %v855_v57 = vsel %vm842_vm0, %v563_v53, %v699_v55  ;;  %v1079_v54 = vld [vmem:[%s1541_s29 + $0x1d8] sm:$0xff]  ;;  %v1078_v55 = vld [vmem:[%s1541_s29 + $0x1d0] sm:$0xff] }
  0xde   : > { %917 = vst [vmem:[%s1644_s3 + $0xd0] sm:$0xff] %v856_v56  ;;  %915 = vst [vmem:[%s1644_s3 + $0xc0] sm:$0xff] %v855_v57 }
  0xe0   : > { %v705_v60 = vpop.permute.xlu1 %704  ;;  %v703_v61 = vpop.permute.xlu0 %702 }
  0xe1   : > { %v858_v62 = vsel %vm842_vm0, %v566_v58, %v705_v60  ;;  %v857_v63 = vsel %vm842_vm0, %v565_v59, %v703_v61  ;;  %v1081_v60 = vld [vmem:[%s1541_s29 + $0x1e8] sm:$0xff]  ;;  %v1080_v61 = vld [vmem:[%s1541_s29 + $0x1e0] sm:$0xff] }
  0xe2   : > { %921 = vst [vmem:[%s1644_s3 + $0xf0] sm:$0xff] %v858_v62  ;;  %919 = vst [vmem:[%s1644_s3 + $0xe0] sm:$0xff] %v857_v63 }
  0xe4   : > { %v709_v2 = vpop.permute.xlu1 %708  ;;  %v707_v3 = vpop.permute.xlu0 %706 }
  0xe5   : > { %v860_v4 = vsel %vm842_vm0, %v568_v0, %v709_v2  ;;  %v859_v5 = vsel %vm842_vm0, %v567_v1, %v707_v3  ;;  %v1083_v2 = vld [vmem:[%s1541_s29 + $0x1f8] sm:$0xff]  ;;  %v1082_v3 = vld [vmem:[%s1541_s29 + $0x1f0] sm:$0xff] }
  0xe6   : > { %925 = vst [vmem:[%s1644_s3 + $0x110] sm:$0xff] %v860_v4  ;;  %923 = vst [vmem:[%s1644_s3 + $0x100] sm:$0xff] %v859_v5 }
  0xe8   : > { %v713_v8 = vpop.permute.xlu1 %712  ;;  %v711_v9 = vpop.permute.xlu0 %710 }
  0xe9   : > { %v862_v10 = vsel %vm842_vm0, %v570_v6, %v713_v8  ;;  %v861_v11 = vsel %vm842_vm0, %v569_v7, %v711_v9  ;;  %v1085_v8 = vld [vmem:[%s1541_s29 + $0x208] sm:$0xff]  ;;  %v1084_v9 = vld [vmem:[%s1541_s29 + $0x200] sm:$0xff] }
  0xea   : > { %929 = vst [vmem:[%s1644_s3 + $0x130] sm:$0xff] %v862_v10  ;;  %927 = vst [vmem:[%s1644_s3 + $0x120] sm:$0xff] %v861_v11 }
  0xec   : > { %v717_v14 = vpop.permute.xlu1 %716  ;;  %v715_v15 = vpop.permute.xlu0 %714 }
  0xed   : > { %v864_v16 = vsel %vm842_vm0, %v572_v12, %v717_v14  ;;  %v863_v17 = vsel %vm842_vm0, %v571_v13, %v715_v15  ;;  %v1087_v14 = vld [vmem:[%s1541_s29 + $0x218] sm:$0xff]  ;;  %v1086_v15 = vld [vmem:[%s1541_s29 + $0x210] sm:$0xff] }
  0xee   : > { %933 = vst [vmem:[%s1644_s3 + $0x150] sm:$0xff] %v864_v16  ;;  %931 = vst [vmem:[%s1644_s3 + $0x140] sm:$0xff] %v863_v17 }
  0xf0   : > { %v721_v20 = vpop.permute.xlu1 %720  ;;  %v719_v21 = vpop.permute.xlu0 %718 }
  0xf1   : > { %v866_v22 = vsel %vm842_vm0, %v574_v18, %v721_v20  ;;  %v865_v23 = vsel %vm842_vm0, %v573_v19, %v719_v21  ;;  %v1089_v20 = vld [vmem:[%s1541_s29 + $0x228] sm:$0xff]  ;;  %v1088_v21 = vld [vmem:[%s1541_s29 + $0x220] sm:$0xff] }
  0xf2   : > { %937 = vst [vmem:[%s1644_s3 + $0x170] sm:$0xff] %v866_v22  ;;  %935 = vst [vmem:[%s1644_s3 + $0x160] sm:$0xff] %v865_v23 }
  0xf4   : > { %v773_v26 = vpop.permute.xlu1 %772  ;;  %v771_v27 = vpop.permute.xlu0 %770 }
  0xf5   : > { %v868_v28 = vsel %vm842_vm0, %v1069_v24, %v773_v26  ;;  %v867_v29 = vsel %vm842_vm0, %v1068_v25, %v771_v27  ;;  %v1091_v26 = vld [vmem:[%s1541_s29 + $0x238] sm:$0xff]  ;;  %v1090_v27 = vld [vmem:[%s1541_s29 + $0x230] sm:$0xff] }
  0xf6   : > { %894 = vst [vmem:[%s1644_s3 + $0x18] sm:$0xff] %v868_v28  ;;  %892 = vst [vmem:[%s1644_s3 + $0x8] sm:$0xff] %v867_v29 }
  0xf8   : > { %v777_v32 = vpop.permute.xlu1 %776  ;;  %v775_v33 = vpop.permute.xlu0 %774 }
  0xf9   : > { %v870_v34 = vsel %vm842_vm0, %v1071_v30, %v777_v32  ;;  %v869_v35 = vsel %vm842_vm0, %v1070_v31, %v775_v33 }
  0xfa   : > { %898 = vst [vmem:[%s1644_s3 + $0x38] sm:$0xff] %v870_v34  ;;  %896 = vst [vmem:[%s1644_s3 + $0x28] sm:$0xff] %v869_v35 }
  0xfc   : > { %v781_v38 = vpop.permute.xlu1 %780  ;;  %v779_v39 = vpop.permute.xlu0 %778 }
  0xfd   : > { %v872_v40 = vsel %vm842_vm0, %v1073_v36, %v781_v38  ;;  %v871_v41 = vsel %vm842_vm0, %v1072_v37, %v779_v39 }
  0xfe   : > { %902 = vst [vmem:[%s1644_s3 + $0x58] sm:$0xff] %v872_v40  ;;  %900 = vst [vmem:[%s1644_s3 + $0x48] sm:$0xff] %v871_v41 }
 0x100   : > { %v785_v44 = vpop.permute.xlu1 %784  ;;  %v783_v45 = vpop.permute.xlu0 %782 }
 0x101   : > { %v874_v46 = vsel %vm842_vm0, %v1075_v42, %v785_v44  ;;  %v873_v47 = vsel %vm842_vm0, %v1074_v43, %v783_v45 }
 0x102   : > { %906 = vst [vmem:[%s1644_s3 + $0x78] sm:$0xff] %v874_v46  ;;  %904 = vst [vmem:[%s1644_s3 + $0x68] sm:$0xff] %v873_v47 }
 0x104   : > { %v789_v50 = vpop.permute.xlu1 %788  ;;  %v787_v51 = vpop.permute.xlu0 %786 }
 0x105   : > { %v876_v52 = vsel %vm842_vm0, %v1077_v48, %v789_v50  ;;  %v875_v53 = vsel %vm842_vm0, %v1076_v49, %v787_v51 }
 0x106   : > { %910 = vst [vmem:[%s1644_s3 + $0x98] sm:$0xff] %v876_v52  ;;  %908 = vst [vmem:[%s1644_s3 + $0x88] sm:$0xff] %v875_v53 }
 0x108   : > { %v793_v56 = vpop.permute.xlu1 %792  ;;  %v791_v57 = vpop.permute.xlu0 %790 }
 0x109   : > { %v878_v58 = vsel %vm842_vm0, %v1079_v54, %v793_v56  ;;  %v877_v59 = vsel %vm842_vm0, %v1078_v55, %v791_v57 }
 0x10a   : > { %914 = vst [vmem:[%s1644_s3 + $0xb8] sm:$0xff] %v878_v58  ;;  %912 = vst [vmem:[%s1644_s3 + $0xa8] sm:$0xff] %v877_v59 }
 0x10c   : > { %v797_v62 = vpop.permute.xlu1 %796  ;;  %v795_v63 = vpop.permute.xlu0 %794 }
 0x10d   : > { %v880_v0 = vsel %vm842_vm0, %v1081_v60, %v797_v62  ;;  %v879_v1 = vsel %vm842_vm0, %v1080_v61, %v795_v63 }
 0x10e   : > { %918 = vst [vmem:[%s1644_s3 + $0xd8] sm:$0xff] %v880_v0  ;;  %916 = vst [vmem:[%s1644_s3 + $0xc8] sm:$0xff] %v879_v1 }
 0x110   : > { %v801_v4 = vpop.permute.xlu1 %800  ;;  %v799_v5 = vpop.permute.xlu0 %798 }
 0x111   : > { %v882_v6 = vsel %vm842_vm0, %v1083_v2, %v801_v4  ;;  %v881_v7 = vsel %vm842_vm0, %v1082_v3, %v799_v5 }
 0x112   : > { %922 = vst [vmem:[%s1644_s3 + $0xf8] sm:$0xff] %v882_v6  ;;  %920 = vst [vmem:[%s1644_s3 + $0xe8] sm:$0xff] %v881_v7 }
 0x114   : > { %v805_v10 = vpop.permute.xlu1 %804  ;;  %v803_v11 = vpop.permute.xlu0 %802 }
 0x115   : > { %v884_v12 = vsel %vm842_vm0, %v1085_v8, %v805_v10  ;;  %v883_v13 = vsel %vm842_vm0, %v1084_v9, %v803_v11 }
 0x116   : > { %926 = vst [vmem:[%s1644_s3 + $0x118] sm:$0xff] %v884_v12  ;;  %924 = vst [vmem:[%s1644_s3 + $0x108] sm:$0xff] %v883_v13 }
 0x118   : > { %v809_v16 = vpop.permute.xlu1 %808  ;;  %v807_v17 = vpop.permute.xlu0 %806 }
 0x119   : > { %v886_v18 = vsel %vm842_vm0, %v1087_v14, %v809_v16  ;;  %v885_v19 = vsel %vm842_vm0, %v1086_v15, %v807_v17 }
 0x11a   : > { %930 = vst [vmem:[%s1644_s3 + $0x138] sm:$0xff] %v886_v18  ;;  %928 = vst [vmem:[%s1644_s3 + $0x128] sm:$0xff] %v885_v19 }
 0x11c   : > { %v813_v22 = vpop.permute.xlu1 %812  ;;  %v811_v23 = vpop.permute.xlu0 %810 }
 0x11d   : > { %v888_v24 = vsel %vm842_vm0, %v1089_v20, %v813_v22  ;;  %v887_v25 = vsel %vm842_vm0, %v1088_v21, %v811_v23 }
 0x11e   : > { %934 = vst [vmem:[%s1644_s3 + $0x158] sm:$0xff] %v888_v24  ;;  %932 = vst [vmem:[%s1644_s3 + $0x148] sm:$0xff] %v887_v25 }
 0x120   : > { %v817_v28 = vpop.permute.xlu1 %816  ;;  %v815_v29 = vpop.permute.xlu0 %814 }
 0x121   : > { %v890_v30 = vsel %vm842_vm0, %v1091_v26, %v817_v28  ;;  %v889_v31 = vsel %vm842_vm0, %v1090_v27, %v815_v29 }
 0x122   : > { %938 = vst [vmem:[%s1644_s3 + $0x178] sm:$0xff] %v890_v30  ;;  %936 = vst [vmem:[%s1644_s3 + $0x168] sm:$0xff] %v889_v31 }
 0x123   : > { %1198 = shalt.err (!%p1195_p7)
}
 0x124   : > { %s1199_s23 = scalar_lea.hbm %s1787_s15, 6144  ;;  %s1203_s26 = scalar_lea.hbm %s1842_s1, 12288 }
 0x125   : > { %p1200_p8 = scmp.ne.s32.totalorder %s1787_s15, %s1199_s23  ;;  %p1204_p13 = scmp.lt.s32.totalorder %s1787_s15, %s1842_s1 }
 0x126   : > { %p1205_p0 = scmp.lt.s32.totalorder %s1203_s26, %s1199_s23 }
 0x127   : > { %p1201_p11 = pnand %p1200_p8, %p1316_p5 }
 0x128   : > { %p1206_p1 = por %p1205_p0, %p1204_p13 }
 0x129   : > { %p1202_p12 = pneg %p1201_p11 }
 0x12b   : > { %p1207_p2 = pnand %p1206_p1, %p1202_p12 }
 0x12d   : > { %1210 = shalt.err (!%p1207_p2)
}
 0x12e   : > { %s1265_s30 = smov 256   ;;  %s1266_s2 = smov 16  }
 0x12f   : > { %1127 = dma.vmem_to_hbm [thread:$0]  (%p1316_p5), %s1789_s5, 6144, %s1787_s15, %s940_s9, %s1265_s30, %s1265_s30, %s1266_s2  }
 0x130 PF: > { %s971_s3 = sand.u32 1, %s1241_s6   ;;  %p1130_p3 = pnand %p1041_p10, %p1327_p9 }
 0x131   : > { %s972_s4 = scalar_lea.sflag [#allocation4], %s971_s3 }
 0x132   : > { %p1131_p4 = pneg %p1130_p3 }
 0x134   : > { %1236 = dma.done.wait (%p1131_p4), %s972_s4, 6144  }
 0x135   : > { %1238 = vsyncadd (%p1131_p4), %s972_s4, 4294961152  ;;  %s14_s11 = sadd.s32 1, %s1261_s11   ;;  %s1845_s6 = smov %s1245_s7 }
 0x136   : > { %p11_p6 = scmp.ge.s32.totalorder %s14_s11, 4   ;;  %s1846_s7 = smov %s1249_s8 }
 0x137   : > { %s1847_s8 = smov %s1325_s18  ;;  %s1848_s9 = smov %s1257_s10 }
 0x138   : > { %s1849_s10 = smov %s1851_s14  ;;  %13 = sbr.rel (!%p11_p6) target bundleno = 4 (0x4), region = 105 }
 0x13d   :  { %977 = vsyncpa [#allocation4], 1 }
 0x13e   :  { %979 = vsyncpa [#allocation4 + $0x1], 1 }

</bundles_post_ra>
